<compile_context>
chip_gen: v7x
topology: tpu7x:2x2x1
jax: 0.10.0
libtpu: 0.0.40
codegen_flags: <defaults>
</compile_context>

<pallas_src>
import functools

import jax
import jax.numpy as jnp
from jax import lax
from jax.experimental import pallas as pl
from jax.experimental.pallas import tpu as pltpu


def _round_up(x, m):
    return (x + m - 1) // m * m


def _pick_chunk(t_tile, b_tile, d, temp_budget_bytes=2 << 20):
    """Largest multiple of 8 that divides t_tile, keeping f32 chunk temps <= budget."""
    if t_tile % 8 != 0:
        return t_tile                      # tiny ragged T (< 8 rows): single chunk
    max_rows = max(8, (temp_budget_bytes // (b_tile * d * 4)) // 8 * 8)
    chunk = 8
    c = 16
    while c <= min(t_tile, max_rows):
        if t_tile % c == 0:
            chunk = c
        c += 8
    return chunk


# ----------------------------------------------------------------------------
# Pallas kernel: tiled  sum(T) -> mean -> ReLU -> Linear -> L2-normalize
# ----------------------------------------------------------------------------
def _embed_norm_kernel(x_ref, w_ref, b_ref, o_ref, acc_ref, *,
                       t_total, t_tile, chunk):
    # x_ref  : (tB, tT, D)   bf16/f32  streamed (batch-tile, time-tile) window of x
    # w_ref  : (D, E_p)      matmul dtype, pre-transposed Linear weight (constant block)
    # b_ref  : (1, E_p)      f32
    # o_ref  : (tB, E_p)     f32   resident across the T axis (index_map constant in t)
    # acc_ref: (tB, sub, D)  f32   time-sum accumulator; the cross-sublane collapse of
    #                              the 'sub' axis is deferred to the epilogue.
    t = pl.program_id(1)
    n_t = pl.num_programs(1)
    sub = acc_ref.shape[1]
    n_chunks = t_tile // chunk            # exact by construction of _pick_chunk

    @pl.when(t == 0)
    def _():
        acc_ref[...] = jnp.zeros_like(acc_ref)

    def accum_chunk(i, mask_tail):
        # Per-chunk load keeps the f32 upcast temporaries chunk-sized while the streamed
        # x tile itself stays bf16 (half the HBM bytes).
        start = pl.multiple_of(i * chunk, chunk)
        xc = x_ref[:, pl.ds(start, chunk), :].astype(jnp.float32)   # (tB, chunk, D)
        if mask_tail:
            # Only the last T tile can overrun t_total.  jnp.where (not multiply) so the
            # unspecified data in out-of-bounds rows of a partial block cannot leak
            # NaN/Inf into valid rows.
            row = start + lax.broadcasted_iota(jnp.int32, (xc.shape[0], chunk), 1)
            valid = t_total - t * t_tile
            xc = jnp.where((row < valid)[:, :, None], xc, 0.0)
        if sub > 1:
            # Collapse the chunk to (tB, sub, D) with vreg-wise VALU adds only (the
            # sublane/XLU collapse is deferred to the epilogue).
            part = xc[:, 0:sub, :]
            for g in range(1, chunk // sub):
                part = part + xc[:, g * sub:(g + 1) * sub, :]
        else:
            part = jnp.sum(xc, axis=1, keepdims=True)      # ragged tiny-T fallback
        acc_ref[...] += part

    def loop_accum(mask_tail):
        def body(i, carry):
            accum_chunk(i, mask_tail)
            return carry
        lax.fori_loop(0, n_chunks, body, 0)

    if t_total % t_tile != 0:
        # Remainder masking runs only on the last T tile (static branch: removed entirely
        # when t_tile divides T).
        @pl.when(t != n_t - 1)
        def _():
            loop_accum(False)

        @pl.when(t == n_t - 1)
        def _():
            loop_accum(True)
    else:
        loop_accum(False)

    @pl.when(t == n_t - 1)
    def _():
        sum_t = jnp.sum(acc_ref[...], axis=1)               # (tB, D): one XLU collapse
        mean = sum_t * (1.0 / t_total)                      # true-T mean, f32
        h = jnp.maximum(mean, 0.0)                          # ReLU
        y = jnp.dot(h.astype(w_ref.dtype), w_ref[...],
                    preferred_element_type=jnp.float32)     # MXU, f32 accumulate
        y = y + b_ref[...]
        ss = jnp.sum(y * y, axis=1, keepdims=True)          # f32 norm reduction
        # F.normalize(dim=1, eps=1e-12): y / max(||y||, 1e-12) == y * rsqrt(max(ss, 1e-24))
        o_ref[...] = y * lax.rsqrt(jnp.maximum(ss, 1e-24))


def embed_and_normalize(x, w_t, b, *, matmul_dtype=jnp.bfloat16,
                        b_tile=None, t_tile=None, x_tile_budget_bytes=None):
    """Fused mean(T) -> ReLU -> Linear -> L2-normalize.

    x   : (B, T, D)  f32 or (preferred) bf16 — the stream dtype decides HBM bytes read.
    w_t : (D, E)     pre-transposed nn.Linear weight.
    b   : (E,)       bias.
    Returns (B, E) float32.  matmul_dtype=jnp.float32 is the exact-parity escape hatch.
    """
    B, T, D = x.shape
    assert w_t.shape[0] == D
    E = w_t.shape[1]

    # Per-generation VMEM capacity (v5e/v6e: 128 MiB; v7x: 64 MiB per TC).
    try:
        vmem_cap = int(pltpu.get_tpu_info().vmem_capacity_bytes)
    except Exception:  # pragma: no cover - conservative fallback works on all parts
        vmem_cap = 64 << 20

    # Lane-dense E (unmasked stores, MXU-friendly N).  x itself is never padded/copied.
    E_p = _round_up(E, 128)
    w_c = w_t.astype(matmul_dtype)
    b2 = b.astype(jnp.float32)
    if E_p != E:
        w_c = jnp.pad(w_c, ((0, 0), (0, E_p - E)))
        b2 = jnp.pad(b2, (0, E_p - E))
    b2 = b2.reshape(1, E_p)

    # Batch tile: sublane multiple, and >= 2 batch tiles whenever B allows it so
    # dimension_semantics="parallel" can shard the HBM stream across v7x's two cores.
    if b_tile is None:
        b_tile = max(8, min(128, _round_up(-(-B // 2), 8)))
    n_b = pl.cdiv(B, b_tile)
    # TODO(synk): for tiny B (< 16) on v7x, split the T reduction across the two cores
    # (per-core partial sums + small combine) instead of batch tiles.

    # Time tile from a VMEM byte budget (x is double-buffered by BlockSpec): ~8 MiB on
    # 64 MiB-VMEM parts (v7x), ~16 MiB on 128 MiB parts (v5e/v6e).
    itemsize = x.dtype.itemsize
    if x_tile_budget_bytes is None:
        x_tile_budget_bytes = (16 << 20) if vmem_cap >= (128 << 20) else (8 << 20)
    if t_tile is None:
        t_tile = max(8, (x_tile_budget_bytes // (b_tile * D * itemsize)) // 8 * 8)
    if t_tile >= T:
        t_tile = T                        # full-dim block is allowed even if T % 8 != 0
    chunk = _pick_chunk(t_tile, b_tile, D)
    sub = 8 if chunk % 8 == 0 else 1
    n_t = pl.cdiv(T, t_tile)
    grid = (n_b, n_t)                     # T (reduction) innermost

    x_tile_bytes = b_tile * t_tile * D * itemsize
    vmem_est = (2 * x_tile_bytes                           # double-buffered x stream
                + 2 * D * E_p * w_c.dtype.itemsize         # weight (constant block)
                + 2 * E_p * 4                              # bias
                + 2 * b_tile * E_p * 4                     # output
                + b_tile * sub * D * 4                     # f32 accumulator scratch
                + 4 * b_tile * chunk * D * 4               # in-kernel chunk temporaries
                + (6 << 20))                               # compiler-internal margin
    vmem_limit = int(min(max(vmem_est, 16 << 20), vmem_cap * 3 // 4))

    cost = pl.CostEstimate(
        flops=int(2 * B * D * E_p + B * T * D),
        transcendentals=int(B),
        bytes_accessed=int(B * T * D * itemsize + D * E_p * w_c.dtype.itemsize
                           + E_p * 4 + n_b * b_tile * E_p * 4),
    )

    kernel = functools.partial(_embed_norm_kernel, t_total=T, t_tile=t_tile, chunk=chunk)

    out = pl.pallas_call(
        kernel,
        # Rows beyond B are scratch for the ragged last batch tile; sliced off below.
        out_shape=jax.ShapeDtypeStruct((n_b * b_tile, E_p), jnp.float32),
        grid_spec=pltpu.PrefetchScalarGridSpec(
            num_scalar_prefetch=0,
            grid=grid,
            in_specs=[
                pl.BlockSpec((b_tile, t_tile, D), lambda i, t: (i, t, 0)),
                # Constant-index blocks: fetched once, live in VMEM for the whole grid.
                # (On v7x, pipeline_mode=pl.Buffered(1) would reclaim their second
                #  buffer; left default here and accounted for in vmem_est instead.)
                pl.BlockSpec((D, E_p), lambda i, t: (0, 0)),
                pl.BlockSpec((1, E_p), lambda i, t: (0, 0)),
            ],
            out_specs=pl.BlockSpec((b_tile, E_p), lambda i, t: (i, 0)),
            scratch_shapes=[pltpu.VMEM((b_tile, sub, D), jnp.float32)],
        ),
        compiler_params=pltpu.CompilerParams(
            dimension_semantics=("parallel", "arbitrary"),
            vmem_limit_bytes=vmem_limit,
        ),
        cost_estimate=cost,
    )(x, w_c, b2)

    return out[:B, :E]


# ----------------------------------------------------------------------------
# Deterministic synthetic SSL model (stand-in for the pretrained ssl_model arg)
# ----------------------------------------------------------------------------
def make_synthetic_ssl_model(key, frame, out_dim, num_layers, x_dtype=jnp.bfloat16):
    keys = jax.random.split(key, num_layers + 1)
    w_in = jax.random.normal(keys[0], (frame, out_dim), jnp.float32) * 0.1
    ws = [jax.random.normal(keys[i + 1], (out_dim, out_dim), jnp.float32) * 0.1
          for i in range(num_layers)]

    def ssl_model(wav, mask=False, features_only=True):
        # wav: (B, T_raw)
        B, T_raw = wav.shape
        T = T_raw // frame
        frames = wav[:, : T * frame].reshape(B, T, frame)
        h = jnp.tanh(frames @ w_in)                        # (B, T, D)
        layer_results = []
        for w_l in ws:
            h = jnp.tanh(h @ w_l)                          # (B, T, D)
            # ssl models expose layer activations as (T, B, D) tuples
            layer_results.append((jnp.transpose(h, (1, 0, 2)), None))
        # Emit the fused-path features in bf16 so the Pallas kernel streams half the HBM
        # bytes; the cast fuses into the producer under jit (not a standalone astype pass).
        return {"x": h.astype(x_dtype), "layer_results": layer_results}

    return ssl_model


# ----------------------------------------------------------------------------
# LossNetLayers (JAX / Pallas)
# ----------------------------------------------------------------------------
class LossNetLayersPallas:
    def __init__(self, ssl_model, ssl_out_dim, emb_dim=256, *, key,
                 matmul_dtype=jnp.bfloat16):
        self.ssl_model = ssl_model
        self.ssl_features = ssl_out_dim
        self.emb_dim = emb_dim
        self.matmul_dtype = matmul_dtype
        k_w, k_b = jax.random.split(key)
        # nn.Linear(ssl_features, emb_dim): weight (emb_dim, ssl_features), bias (emb_dim,)
        bound = 1.0 / float(ssl_out_dim) ** 0.5
        w = jax.random.uniform(k_w, (emb_dim, ssl_out_dim), jnp.float32, -bound, bound)
        self.b = jax.random.uniform(k_b, (emb_dim,), jnp.float32, -bound, bound)
        # Stored pre-transposed once (D, E): no per-call transpose / HBM round trip.
        self.w_t = jnp.transpose(w)

    def __call__(self, wav):
        # wav: (B, 1, T_raw)  ->  (B, T_raw)
        wav = jnp.squeeze(wav, axis=1)
        res = self.ssl_model(wav, mask=False, features_only=True)

        # [x[0].permute(1, 0, 2) for x in res['layer_results']]  (module glue).  Under
        # jit, XLA cancels this permute against the (B,T,D)->(T,B,D) transpose inside the
        # synthetic ssl model, so no HBM copy is materialized here.
        # TODO(synk): for a real pretrained ssl_model, fuse this permute into the
        # downstream consumer of lossnet_layers instead of materializing per-layer copies.
        lossnet_layers = [jnp.transpose(lr[0], (1, 0, 2))
                          for lr in res["layer_results"]]

        x = res["x"]                                       # (B, T, D), bf16 stream
        emb = embed_and_normalize(x, self.w_t, self.b,
                                  matmul_dtype=self.matmul_dtype)   # (B, emb_dim)
        lossnet_layers.append(emb)
        return lossnet_layers


# ----------------------------------------------------------------------------
if __name__ == "__main__":
    B, T_RAW, FRAME = 2, 256, 16          # -> T = 16 frames
    SSL_OUT_DIM = 256                     # lane-aligned D (real SSL: 768 / 1024)
    EMB_DIM = 256                         # module default, 2x128 lanes
    NUM_LAYERS = 3

    root = jax.random.PRNGKey(0)
    k_ssl, k_mod, k_wav, k_extra = jax.random.split(root, 4)

    ssl_model = make_synthetic_ssl_model(k_ssl, FRAME, SSL_OUT_DIM, NUM_LAYERS)
    model = LossNetLayersPallas(ssl_model, SSL_OUT_DIM, EMB_DIM, key=k_mod)

    wav = jax.random.normal(k_wav, (B, 1, T_RAW), jnp.float32)
    forward = jax.jit(lambda w: model(w))
    outs = jax.block_until_ready(forward(wav))

    # Reference of the fused path with the same operand dtypes (bf16 x stream + bf16 MXU
    # operands, f32 accumulate / normalize).  For bit-closer parity with the PyTorch f32
    # path, use matmul_dtype=jnp.float32 and an f32-emitting ssl model.
    x = ssl_model(jnp.squeeze(wav, 1))["x"].astype(jnp.float32)
    x_tr = jnp.mean(x, axis=1)
    h = jnp.maximum(x_tr, 0.0)
    y_ref = jnp.dot(h.astype(jnp.bfloat16), model.w_t.astype(jnp.bfloat16),
                    preferred_element_type=jnp.float32) + model.b
    y_ref = y_ref * lax.rsqrt(jnp.maximum(
        jnp.sum(y_ref * y_ref, axis=1, keepdims=True), 1e-24))

    assert len(outs) == NUM_LAYERS + 1
    for lr in outs[:-1]:
        assert lr.shape == (B, T_RAW // FRAME, SSL_OUT_DIM)
    assert outs[-1].shape == (B, EMB_DIM)
    assert bool(jnp.allclose(outs[-1], y_ref, atol=2e-3, rtol=1e-2)), (
        "max abs diff = %g" % float(jnp.max(jnp.abs(outs[-1] - y_ref))))

    # Extra check: multi-tile T with a ragged remainder (exercises the masked last T
    # tile), ragged last batch tile, and f32 streaming through the same kernel.
    B2, T2, D2, E2 = 4, 40, 256, 256
    k_x2, k_w2, k_b2 = jax.random.split(k_extra, 3)
    x2 = jax.random.normal(k_x2, (B2, T2, D2), jnp.float32)
    w2 = jax.random.normal(k_w2, (D2, E2), jnp.float32) * 0.05
    bb2 = jax.random.normal(k_b2, (E2,), jnp.float32) * 0.05
    emb2 = jax.block_until_ready(embed_and_normalize(x2, w2, bb2, t_tile=16))
    h2 = jnp.maximum(jnp.mean(x2, axis=1), 0.0)
    y2 = jnp.dot(h2.astype(jnp.bfloat16), w2.astype(jnp.bfloat16),
                 preferred_element_type=jnp.float32) + bb2
    y2 = y2 * lax.rsqrt(jnp.maximum(jnp.sum(y2 * y2, axis=1, keepdims=True), 1e-24))
    assert emb2.shape == (B2, E2)
    assert bool(jnp.allclose(emb2, y2, atol=2e-3, rtol=1e-2)), (
        "max abs diff = %g" % float(jnp.max(jnp.abs(emb2 - y2))))

    print("KERNEL_OK")
</pallas_src>

<mosaic_0001>
module attributes {stable_mosaic.version = 11 : i64} {
  func.func @_embed_norm_kernel(%arg0: i32, %arg1: i32, %arg2: memref<8x16x256xbf16, #tpu.memory_space<vmem>>, %arg3: memref<256x256xbf16, #tpu.memory_space<vmem>>, %arg4: memref<1x256xf32, #tpu.memory_space<vmem>>, %arg5: memref<8x256xf32, #tpu.memory_space<vmem>>, %arg6: memref<8x8x256xf32, #tpu.memory_space<vmem>>) attributes {dimension_semantics = [#tpu.dimension_semantics<parallel>, #tpu.dimension_semantics<arbitrary>], iteration_bounds = array<i64: 1, 1>, scalar_prefetch = 0 : i64, scratch_operands = 1 : i64, tpu.core_type = #tpu.core_type<tc>, window_params = [{transform_indices = @transform_0, window_bounds = array<i64: 8, 16, 256>}, {pipeline_mode = #tpu.pipeline_mode<synchronous>, transform_indices = @transform_1, window_bounds = array<i64: 256, 256>}, {pipeline_mode = #tpu.pipeline_mode<synchronous>, transform_indices = @transform_2, window_bounds = array<i64: 1, 256>}, {transform_indices = @transform_3, window_bounds = array<i64: 8, 256>}]} {
    %c0_i32 = arith.constant 0 : i32
    %0 = arith.cmpi eq, %arg1, %c0_i32 : i32
    %1 = arith.extui %0 : i1 to i32
    %c0_i32_0 = arith.constant 0 : i32
    %2 = arith.cmpi ne, %1, %c0_i32_0 : i32
    scf.if %2 {
      %cst = arith.constant 0.000000e+00 : f32
      %17 = vector.broadcast %cst : f32 to vector<8x8x256xf32>
      %c0_11 = arith.constant 0 : index
      %c0_12 = arith.constant 0 : index
      %c0_13 = arith.constant 0 : index
      %18 = vector.load %arg6[%c0_11, %c0_12, %c0_13] : memref<8x8x256xf32, #tpu.memory_space<vmem>>, vector<8x8x256xf32>
      tpu.vector_store %arg6[%c0_11, %c0_12, %c0_13], %17 {strides = array<i32>} : memref<8x8x256xf32, #tpu.memory_space<vmem>>, vector<8x8x256xf32>,
    } else {
    }
    %c0_i32_1 = arith.constant 0 : i32
    %c16_i32 = arith.constant 16 : i32
    %3 = arith.muli %c0_i32_1, %c16_i32 : i32
    %4 = tpu.assume_multiple %3, 16 : i32
    %c0 = arith.constant 0 : index
    %5 = arith.index_cast %4 : i32 to index
    %c0_2 = arith.constant 0 : index
    %6 = vector.load %arg2[%c0, %5, %c0_2] : memref<8x16x256xbf16, #tpu.memory_space<vmem>>, vector<8x16x256xbf16>
    %7 = arith.extf %6 : vector<8x16x256xbf16> to vector<8x16x256xf32>
    %8 = vector.extract_strided_slice %7 {offsets = [0, 0, 0], sizes = [8, 8, 256], strides = [1, 1, 1]} : vector<8x16x256xf32> to vector<8x8x256xf32>
    %9 = vector.extract_strided_slice %7 {offsets = [0, 8, 0], sizes = [8, 8, 256], strides = [1, 1, 1]} : vector<8x16x256xf32> to vector<8x8x256xf32>
    %10 = arith.addf %8, %9 : vector<8x8x256xf32>
    %c0_3 = arith.constant 0 : index
    %c0_4 = arith.constant 0 : index
    %c0_5 = arith.constant 0 : index
    %11 = vector.load %arg6[%c0_3, %c0_4, %c0_5] : memref<8x8x256xf32, #tpu.memory_space<vmem>>, vector<8x8x256xf32>
    %12 = arith.addf %11, %10 : vector<8x8x256xf32>
    %c0_6 = arith.constant 0 : index
    %c0_7 = arith.constant 0 : index
    %c0_8 = arith.constant 0 : index
    %13 = vector.load %arg6[%c0_6, %c0_7, %c0_8] : memref<8x8x256xf32, #tpu.memory_space<vmem>>, vector<8x8x256xf32>
    tpu.vector_store %arg6[%c0_6, %c0_7, %c0_8], %12 {strides = array<i32>} : memref<8x8x256xf32, #tpu.memory_space<vmem>>, vector<8x8x256xf32>,
    %c1_i32 = arith.constant 1 : i32
    %c0_i32_9 = arith.constant 0 : i32
    %14 = arith.cmpi eq, %arg1, %c0_i32_9 : i32
    %15 = arith.extui %14 : i1 to i32
    %c0_i32_10 = arith.constant 0 : i32
    %16 = arith.cmpi ne, %15, %c0_i32_10 : i32
    scf.if %16 {
      %c0_11 = arith.constant 0 : index
      %c0_12 = arith.constant 0 : index
      %c0_13 = arith.constant 0 : index
      %17 = vector.load %arg6[%c0_11, %c0_12, %c0_13] : memref<8x8x256xf32, #tpu.memory_space<vmem>>, vector<8x8x256xf32>
      %cst = arith.constant dense<0.000000e+00> : vector<8x256xf32>
      %18 = vector.multi_reduction <add>, %17, %cst [1] : vector<8x8x256xf32> to vector<8x256xf32>
      %cst_14 = arith.constant 6.250000e-02 : f32
      %19 = vector.broadcast %cst_14 : f32 to vector<8x256xf32>
      %20 = arith.mulf %18, %19 : vector<8x256xf32>
      %cst_15 = arith.constant 0.000000e+00 : f32
      %21 = vector.broadcast %cst_15 : f32 to vector<8x256xf32>
      %22 = arith.maximumf %20, %21 : vector<8x256xf32>
      %23 = arith.truncf %22 : vector<8x256xf32> to vector<8x256xbf16>
      %c0_16 = arith.constant 0 : index
      %c0_17 = arith.constant 0 : index
      %24 = vector.load %arg3[%c0_16, %c0_17] : memref<256x256xbf16, #tpu.memory_space<vmem>>, vector<256x256xbf16>
      %cst_18 = arith.constant dense<0.000000e+00> : vector<8x256xf32>
      %25 = tpu.matmul %23, %24, %cst_18 {dimension_numbers = #tpu.dot_dimension_numbers<[1], [0], [0], [1], [0, 0, 1, 1], [], []>} : vector<8x256xbf16>, vector<256x256xbf16>, vector<8x256xf32> -> vector<8x256xf32>
      %c0_19 = arith.constant 0 : index
      %c0_20 = arith.constant 0 : index
      %26 = vector.load %arg4[%c0_19, %c0_20] : memref<1x256xf32, #tpu.memory_space<vmem>>, vector<1x256xf32>
      %27 = vector.broadcast %26 : vector<1x256xf32> to vector<8x256xf32>
      %28 = arith.addf %25, %27 : vector<8x256xf32>
      %29 = arith.mulf %28, %28 : vector<8x256xf32>
      %cst_21 = arith.constant dense<0.000000e+00> : vector<8xf32>
      %30 = vector.multi_reduction <add>, %29, %cst_21 [1] : vector<8x256xf32> to vector<8xf32>
      %31 = vector.shape_cast %30 : vector<8xf32> to vector<8x1xf32>
      %cst_22 = arith.constant 1.000000e-24 : f32
      %32 = vector.broadcast %cst_22 : f32 to vector<8x1xf32>
      %33 = arith.maximumf %31, %32 : vector<8x1xf32>
      %34 = math.rsqrt %33 : vector<8x1xf32>
      %35 = vector.broadcast %34 : vector<8x1xf32> to vector<8x256xf32>
      %36 = arith.mulf %28, %35 : vector<8x256xf32>
      %c0_23 = arith.constant 0 : index
      %c0_24 = arith.constant 0 : index
      %37 = vector.load %arg5[%c0_23, %c0_24] : memref<8x256xf32, #tpu.memory_space<vmem>>, vector<8x256xf32>
      tpu.vector_store %arg5[%c0_23, %c0_24], %36 {strides = array<i32>} : memref<8x256xf32, #tpu.memory_space<vmem>>, vector<8x256xf32>,
    } else {
    }
    return
  }
  func.func @transform_0(%arg0: i32, %arg1: i32) -> (i32, i32, i32) {
    %c0_i32 = arith.constant 0 : i32
    %c0_i32_0 = arith.constant 0 : i32
    return %arg0, %arg1, %c0_i32 : i32, i32, i32
  }
  func.func @transform_1(%arg0: i32, %arg1: i32) -> (i32, i32) {
    %c0_i32 = arith.constant 0 : i32
    %c0_i32_0 = arith.constant 0 : i32
    %c0_i32_1 = arith.constant 0 : i32
    return %c0_i32, %c0_i32_0 : i32, i32
  }
  func.func @transform_2(%arg0: i32, %arg1: i32) -> (i32, i32) {
    %c0_i32 = arith.constant 0 : i32
    %c0_i32_0 = arith.constant 0 : i32
    %c0_i32_1 = arith.constant 0 : i32
    return %c0_i32, %c0_i32_0 : i32, i32
  }
  func.func @transform_3(%arg0: i32, %arg1: i32) -> (i32, i32) {
    %c0_i32 = arith.constant 0 : i32
    %c0_i32_0 = arith.constant 0 : i32
    return %arg0, %c0_i32 : i32, i32
  }
}

</mosaic_0001>

<bundles_post_ra>
// kernel: squeeze.1
= control target key start
LH: loop header
LB: loop body
LE: loop exit
PB: predicated region body
PF: predicated region fallthrough
CT: control target
= control target key end

     0   :  { %vm34_vm0 = vcmask 130048   ;;  %s136_s10 = smov 80   ;;  %s137_s11 = smov 96   ;;  %s173_s0 = inlined_call_operand.vmem [shape: bf16[2,256], index: 0, kind: input, shape index: {}]   ;;  %s174_s1 = inlined_call_operand.vmem [shape: bf16[2,16,16], index: 1, kind: output, shape index: {}]  }
   0x1   :  { %v113_v0 = vld [vmem:[%s173_s0 + $0x1] sm:$0x1]  ;;  %v29_v1 = vld [vmem:[%s173_s0] sm:$0x1]  ;;  %s135_s0 = smov 112   ;;  %s138_s12 = smov 64  }
   0x2   :  { %v16_v2 = vunpack.c.l.bf16 %v113_v0  ;;  %v30_v3 = vunpack.c.l.bf16 %v29_v1  ;;  %s139_s13 = smov 48   ;;  %s140_s14 = smov 32  }
   0x3   :  { %s141_s15 = smov 16  }
   0x4   :  { %19 = vst [vmem:[#allocation1 + $0x8] sm:$0x3] %v16_v2  ;;  %32 = vst [vmem:[#allocation1] sm:$0x3] %v30_v3 }
   0xb   :  { %v41_v4 = vld.sshfl [vmem:[#allocation1] sm:$0xff pattern:$0x99999180]  }
   0xc   :  { %v33_v5 = vld [vmem:[#allocation1] sm:$0x3]   ;;  %42 = vrot.lane.b32.xlu0 %v41_v4, %s135_s0  ;;  %54 = vrot.lane.b32.xlu1 %v41_v4, %s136_s10  ;;  %v37_v6 = vld [vmem:[#allocation1 + $0x8] sm:$0x3]  }
   0xd   :  { %35 = vst.msk [vmem:[#allocation0] ss:$16 sm:$0x3] %vm34_vm0, %v33_v5   ;;  %40 = vst.msk [vmem:[#allocation0 + $0x8] ss:$16 sm:$0x3] %vm34_vm0, %v37_v6  }
  0x10   :  { %48 = vrot.lane.b32.xlu0 %v41_v4, %s137_s11  ;;  %60 = vrot.lane.b32.xlu1 %v41_v4, %s138_s12 }
  0x14   :  { %66 = vrot.lane.b32.xlu0 %v41_v4, %s139_s13  ;;  %72 = vrot.lane.b32.xlu1 %v41_v4, %s140_s14 }
  0x18   :  { %78 = vrot.lane.b32.xlu0 %v41_v4, %s141_s15 }
  0x7e   :  { %v43_v7 = vpop.permute.xlu0 %42   ;;  %v55_v8 = vpop.permute.xlu1 %54  }
  0x7f   :  { %46 = vst.msk [vmem:[#allocation0 + $0x1] ss:$8 sm:$0xf] %vm34_vm0, %v43_v7   ;;  %58 = vst.msk [vmem:[#allocation0 + $0x3] ss:$8 sm:$0xf] %vm34_vm0, %v55_v8  }
  0x82   :  { %v49_v9 = vpop.permute.xlu0 %48   ;;  %v61_v10 = vpop.permute.xlu1 %60  }
  0x83   :  { %52 = vst.msk [vmem:[#allocation0 + $0x2] ss:$8 sm:$0xf] %vm34_vm0, %v49_v9   ;;  %64 = vst.msk [vmem:[#allocation0 + $0x4] ss:$8 sm:$0xf] %vm34_vm0, %v61_v10  }
  0x86   :  { %v67_v11 = vpop.permute.xlu0 %66   ;;  %v73_v12 = vpop.permute.xlu1 %72  }
  0x87   :  { %70 = vst.msk [vmem:[#allocation0 + $0x5] ss:$8 sm:$0xf] %vm34_vm0, %v67_v11   ;;  %76 = vst.msk [vmem:[#allocation0 + $0x6] ss:$8 sm:$0xf] %vm34_vm0, %v73_v12  }
  0x8a   :  { %v79_v13 = vpop.permute.xlu0 %78  }
  0x8b   :  { %82 = vst.msk [vmem:[#allocation0 + $0x7] ss:$8 sm:$0xf] %vm34_vm0, %v79_v13  }
  0x92   :  { %v87_v14 = vld [vmem:[#allocation0] sm:$0xff]  ;;  %v92_v15 = vld [vmem:[#allocation0 + $0x8] sm:$0xff]  ;;  %v98_v16 = vld [vmem:[#allocation0 + $0x10] sm:$0xff] }
  0x93   :  { %v120_v17 = vpack.c.bf16 %v92_v15, %v87_v14  ;;  %v105_v18 = vld [vmem:[#allocation0 + $0x18] sm:$0xff] }
  0x94   :  { %v125_v19 = vpack.c.bf16 %v105_v18, %v98_v16 }
  0x95   :  { %121 = vst [vmem:[%s174_s1] sm:$0xff] %v120_v17  }
  0x96   :  { %127 = vst [vmem:[%s174_s1 + $0x8] sm:$0xff] %v125_v19  }

// kernel: _lambda_.1
= control target key start
LH: loop header
LB: loop body
LE: loop exit
PB: predicated region body
PF: predicated region fallthrough
CT: control target
= control target key end

     0   :  { %vm388_vm0 = vcmask 1041409   ;;  %vm390_vm1 = vcmask 1042434   ;;  %vm392_vm2 = vcmask 1043459   ;;  %vm394_vm3 = vcmask 1044484   ;;  %s994_s1 = inlined_call_operand.vmem [shape: bf16[256,256], index: 1, kind: input, shape index: {}]   ;;  %s995_s0 = inlined_call_operand.vmem [shape: bf16[2,16,256], index: 0, kind: input, shape index: {}]   ;;  %s996_s2 = inlined_call_operand.vmem [shape: f32[1,256], index: 2, kind: input, shape index: {}]   ;;  %s997_s3 = inlined_call_operand.vmem [shape: f32[8,256], index: 3, kind: output, shape index: {}]  }
   0x1   :  { %v661_v0 = vld [vmem:[%s994_s1 + $0x4] ss:$8 sps:$4 sm:$0xff]   ;;  %v663_v1 = vld [vmem:[%s994_s1] ss:$8 sps:$4 sm:$0xff]   ;;  %v664_v2 = vld [vmem:[%s994_s1 + $0x14] ss:$8 sps:$4 sm:$0xff]  }
   0x2   :  { %573 = vmatprep.subr.bf16.mxu0 %v661_v0  ;;  %v666_v3 = vld [vmem:[%s994_s1 + $0x10] ss:$8 sps:$4 sm:$0xff]   ;;  %v667_v4 = vld [vmem:[%s994_s1 + $0x24] ss:$8 sps:$4 sm:$0xff]   ;;  %v669_v5 = vld [vmem:[%s994_s1 + $0x20] ss:$8 sps:$4 sm:$0xff]  }
   0x3   :  { %574 = vmatpush1.bf16.msra.mxu0 %v663_v1  ;;  %v670_v6 = vld [vmem:[%s994_s1 + $0x34] ss:$8 sps:$4 sm:$0xff]   ;;  %v672_v7 = vld [vmem:[%s994_s1 + $0x30] ss:$8 sps:$4 sm:$0xff]   ;;  %v673_v8 = vld [vmem:[%s994_s1 + $0x44] ss:$8 sps:$4 sm:$0xff]  }
   0x4   :  { %575 = vmatprep.subr.bf16.mxu0 %v664_v2  ;;  %v675_v9 = vld [vmem:[%s994_s1 + $0x40] ss:$8 sps:$4 sm:$0xff]   ;;  %v676_v10 = vld [vmem:[%s994_s1 + $0x54] ss:$8 sps:$4 sm:$0xff]   ;;  %v678_v11 = vld [vmem:[%s994_s1 + $0x50] ss:$8 sps:$4 sm:$0xff]  }
   0x5   :  { %v679_v12 = vld [vmem:[%s994_s1 + $0x64] ss:$8 sps:$4 sm:$0xff]   ;;  %v681_v13 = vld [vmem:[%s994_s1 + $0x60] ss:$8 sps:$4 sm:$0xff]   ;;  %v682_v16 = vld [vmem:[%s994_s1 + $0x74] ss:$8 sps:$4 sm:$0xff]  }
   0x6   :  { %v776_v14 = vld [vmem:[%s995_s0] sm:$0xff]  ;;  %v781_v15 = vld [vmem:[%s995_s0 + $0x8] sm:$0xff]  ;;  %v789_v17 = vld [vmem:[%s995_s0 + $0x10] sm:$0xff]  ;;  %vm396_vm4 = vcmask 1045509   ;;  %vm398_vm5 = vcmask 1046534   ;;  %vm400_vm6 = vcmask 1047559  }
   0x7   :  { %576 = vmatpush1.bf16.msra.mxu0 %v666_v3  ;;  %v794_v18 = vld [vmem:[%s995_s0 + $0x18] sm:$0xff]  ;;  %v799_v19 = vld [vmem:[%s995_s0 + $0x20] sm:$0xff]  ;;  %v53_v20 = vunpack.c.l.bf16 %v776_v14  ;;  %v54_v21 = vunpack.c.h.bf16 %v776_v14  ;;  %v55_v22 = vunpack.c.l.bf16 %v781_v15  ;;  %v56_v23 = vunpack.c.h.bf16 %v781_v15  ;;  %v808_v24 = vld [vmem:[%s995_s0 + $0x28] sm:$0xff] }
   0x8   :  { %577 = vmatprep.subr.bf16.mxu0 %v667_v4  ;;  %v813_v25 = vld [vmem:[%s995_s0 + $0x30] sm:$0xff]  ;;  %v818_v26 = vld [vmem:[%s995_s0 + $0x38] sm:$0xff]  ;;  %v57_v27 = vunpack.c.l.bf16 %v789_v17  ;;  %v58_v28 = vunpack.c.h.bf16 %v789_v17  ;;  %v59_v29 = vunpack.c.l.bf16 %v794_v18  ;;  %v60_v30 = vunpack.c.h.bf16 %v794_v18  ;;  %v827_v31 = vld [vmem:[%s995_s0 + $0x40] sm:$0xff] }
   0x9   :  { %v832_v32 = vld [vmem:[%s995_s0 + $0x48] sm:$0xff]  ;;  %v837_v33 = vld [vmem:[%s995_s0 + $0x50] sm:$0xff]  ;;  %v61_v34 = vunpack.c.l.bf16 %v799_v19  ;;  %v62_v35 = vunpack.c.h.bf16 %v799_v19  ;;  %v63_v36 = vunpack.c.l.bf16 %v808_v24  ;;  %v64_v37 = vunpack.c.h.bf16 %v808_v24  ;;  %v846_v38 = vld [vmem:[%s995_s0 + $0x58] sm:$0xff] }
   0xa   :  { %v851_v39 = vld [vmem:[%s995_s0 + $0x60] sm:$0xff]  ;;  %v856_v40 = vld [vmem:[%s995_s0 + $0x68] sm:$0xff]  ;;  %v65_v41 = vunpack.c.l.bf16 %v813_v25  ;;  %v66_v42 = vunpack.c.h.bf16 %v813_v25  ;;  %v67_v43 = vunpack.c.l.bf16 %v818_v26  ;;  %v68_v44 = vunpack.c.h.bf16 %v818_v26  ;;  %v865_v45 = vld [vmem:[%s995_s0 + $0x70] sm:$0xff] }
   0xb   :  { %578 = vmatpush1.bf16.msra.mxu0 %v669_v5  ;;  %v870_v46 = vld [vmem:[%s995_s0 + $0x78] sm:$0xff]  ;;  %v69_v47 = vunpack.c.l.bf16 %v827_v31  ;;  %v70_v48 = vunpack.c.h.bf16 %v827_v31  ;;  %v71_v49 = vunpack.c.l.bf16 %v832_v32  ;;  %v72_v50 = vunpack.c.h.bf16 %v832_v32  ;;  %v685_v56 = vld [vmem:[%s994_s1 + $0x84] ss:$8 sps:$4 sm:$0xff]   ;;  %v687_v5 = vld [vmem:[%s994_s1 + $0x80] ss:$8 sps:$4 sm:$0xff]  }
   0xc   :  { %579 = vmatprep.subr.bf16.mxu0 %v670_v6  ;;  %v684_v51 = vld [vmem:[%s994_s1 + $0x70] ss:$8 sps:$4 sm:$0xff]   ;;  %v73_v52 = vunpack.c.l.bf16 %v837_v33  ;;  %v74_v53 = vunpack.c.h.bf16 %v837_v33  ;;  %v75_v54 = vunpack.c.l.bf16 %v846_v38  ;;  %v76_v55 = vunpack.c.h.bf16 %v846_v38  ;;  %v705_v24 = vld [vmem:[%s994_s1 + $0xe0] ss:$8 sps:$4 sm:$0xff]   ;;  %v706_v31 = vld [vmem:[%s994_s1 + $0xf4] ss:$8 sps:$4 sm:$0xff]  }
   0xd   :  { %v77_v57 = vunpack.c.l.bf16 %v851_v39  ;;  %v78_v58 = vunpack.c.h.bf16 %v851_v39  ;;  %v79_v59 = vunpack.c.l.bf16 %v856_v40  ;;  %v80_v60 = vunpack.c.h.bf16 %v856_v40 }
   0xe   :  { %v81_v61 = vunpack.c.l.bf16 %v865_v45  ;;  %v82_v62 = vunpack.c.h.bf16 %v865_v45  ;;  %v83_v63 = vunpack.c.l.bf16 %v870_v46  ;;  %v84_v0 = vunpack.c.h.bf16 %v870_v46 }
   0xf   :  { %580 = vmatpush1.bf16.msra.mxu0 %v672_v7  ;;  %v86_v1 = vadd.f32 %v56_v23, %v54_v21  ;;  %v88_v2 = vadd.f32 %v60_v30, %v58_v28  ;;  %v90_v3 = vadd.f32 %v64_v37, %v62_v35  ;;  %v92_v4 = vadd.f32 %v68_v44, %v66_v42 }
  0x10   :  { %581 = vmatprep.subr.bf16.mxu0 %v673_v8  ;;  %v94_v6 = vadd.f32 %v72_v50, %v70_v48  ;;  %v96_v7 = vadd.f32 %v76_v55, %v74_v53  ;;  %v98_v8 = vadd.f32 %v80_v60, %v78_v58  ;;  %v690_v48 = vld [vmem:[%s994_s1 + $0x90] ss:$8 sps:$4 sm:$0xff]   ;;  %v91_v14 = vadd.f32 %v67_v43, %v65_v41 }
  0x11   :  { %v93_v15 = vadd.f32 %v71_v49, %v69_v47  ;;  %v95_v17 = vadd.f32 %v75_v54, %v73_v52  ;;  %v97_v19 = vadd.f32 %v79_v59, %v77_v57  ;;  %v708_v49 = vld [vmem:[%s994_s1 + $0xf0] ss:$8 sps:$4 sm:$0xff]  }
  0x12   :  { %v222_v21 = vrot.slane %v94_v6, 4  ;;  %v234_v23 = vrot.slane %v96_v7, 4  ;;  %v246_v28 = vrot.slane %v98_v8, 4 }
  0x13   :  { %582 = vmatpush1.bf16.msra.mxu0 %v675_v9  ;;  %v100_v9 = vadd.f32 %v84_v0, %v82_v62 }
  0x14   :  { %583 = vmatprep.subr.bf16.mxu0 %v676_v10  ;;  %v688_v10 = vld [vmem:[%s994_s1 + $0x94] ss:$8 sps:$4 sm:$0xff]   ;;  %v223_v50 = vadd.f32 %v222_v21, %v94_v6  ;;  %v247_v53 = vadd.f32 %v246_v28, %v98_v8 }
  0x15   :  { %v258_v30 = vrot.slane %v100_v9, 4 }
  0x17   :  { %584 = vmatpush1.bf16.msra.mxu0 %v678_v11  ;;  %v174_v11 = vrot.slane %v86_v1, 4  ;;  %v259_v55 = vadd.f32 %v258_v30, %v100_v9 }
  0x18   :  { %585 = vmatprep.subr.bf16.mxu0 %v679_v12  ;;  %v186_v12 = vrot.slane %v88_v2, 4 }
  0x19   :  { %v175_v35 = vadd.f32 %v174_v11, %v86_v1  ;;  %v224_v1 = vrot.slane %v223_v50, 2 }
  0x1a   :  { %v187_v37 = vadd.f32 %v186_v12, %v88_v2 }
  0x1b   :  { %586 = vmatpush1.bf16.msra.mxu0 %v681_v13  ;;  %v198_v13 = vrot.slane %v90_v3, 4  ;;  %v176_v58 = vrot.slane %v175_v35, 2  ;;  %v225_v8 = vadd.f32 %v224_v1, %v223_v50 }
  0x1c   :  { %587 = vmatprep.subr.bf16.mxu0 %v682_v16  ;;  %v210_v16 = vrot.slane %v92_v4, 4  ;;  %v188_v60 = vrot.slane %v187_v37, 2 }
  0x1d   :  { %v199_v42 = vadd.f32 %v198_v13, %v90_v3  ;;  %v248_v3 = vrot.slane %v247_v53, 2 }
  0x1e   :  { %v211_v44 = vadd.f32 %v210_v16, %v92_v4  ;;  %v260_v4 = vrot.slane %v259_v55, 2  ;;  %v189_v11 = vadd.f32 %v188_v60, %v187_v37  ;;  %v694_v16 = vld [vmem:[%s994_s1 + $0xb4] ss:$8 sps:$4 sm:$0xff]  }
  0x1f   :  { %588 = vmatpush1.bf16.msra.mxu0 %v684_v51  ;;  %v235_v51 = vadd.f32 %v234_v23, %v96_v7  ;;  %v200_v62 = vrot.slane %v199_v42, 2  ;;  %v693_v7 = vld [vmem:[%s994_s1 + $0xa0] ss:$8 sps:$4 sm:$0xff]  }
  0x20   :  { %589 = vmatprep.subr.bf16.mxu0 %v685_v56  ;;  %v691_v56 = vld [vmem:[%s994_s1 + $0xa4] ss:$8 sps:$4 sm:$0xff]   ;;  %v212_v0 = vrot.slane %v211_v44, 2  ;;  %v261_v13 = vadd.f32 %v260_v4, %v259_v55  ;;  %v190_v23 = vrot.slane %v189_v11, 1 }
  0x21   :  { %v236_v2 = vrot.slane %v235_v51, 2  ;;  %v201_v12 = vadd.f32 %v200_v62, %v199_v42 }
  0x22   :  { %v213_v6 = vadd.f32 %v212_v0, %v211_v44  ;;  %v262_v44 = vrot.slane %v261_v13, 1  ;;  %v697_v0 = vld [vmem:[%s994_s1 + $0xc4] ss:$8 sps:$4 sm:$0xff]  }
  0x23   :  { %590 = vmatpush1.bf16.msra.mxu0 %v687_v5  ;;  %v177_v5 = vadd.f32 %v176_v58, %v175_v35  ;;  %v237_v9 = vadd.f32 %v236_v2, %v235_v51  ;;  %v202_v28 = vrot.slane %v201_v12, 1  ;;  %v226_v35 = vrot.slane %v225_v8, 1 }
  0x24   :  { %591 = vmatprep.subr.bf16.mxu0 %v688_v10  ;;  %v249_v10 = vadd.f32 %v248_v3, %v247_v53  ;;  %v214_v30 = vrot.slane %v213_v6, 1  ;;  %v191_v58 = vadd.f32 %v190_v23, %v189_v11  ;;  %v696_v53 = vld [vmem:[%s994_s1 + $0xb0] ss:$8 sps:$4 sm:$0xff]   ;;  %v263_v62 = vadd.f32 %v262_v44, %v261_v13  ;;  %v699_v13 = vld [vmem:[%s994_s1 + $0xc0] ss:$8 sps:$4 sm:$0xff]  }
  0x25   :  { %v178_v21 = vrot.slane %v177_v5, 1  ;;  %v238_v37 = vrot.slane %v237_v9, 1  ;;  %v203_v50 = vadd.f32 %v202_v28, %v201_v12  ;;  %v227_v55 = vadd.f32 %v226_v35, %v225_v8 }
  0x26   :  { %v250_v42 = vrot.slane %v249_v10, 1  ;;  %v215_v51 = vadd.f32 %v214_v30, %v213_v6  ;;  %v267_v2 = vmul.f32 0.0625, %v191_v58  ;;  %v279_v6 = vmul.f32 0.0625, %v263_v62  ;;  %v700_v30 = vld [vmem:[%s994_s1 + $0xd4] ss:$8 sps:$4 sm:$0xff]  }
  0x27   :  { %592 = vmatpush1.bf16.msra.mxu0 %v690_v48  ;;  %v179_v48 = vadd.f32 %v178_v21, %v177_v5  ;;  %v269_v3 = vmul.f32 0.0625, %v203_v50  ;;  %v273_v5 = vmul.f32 0.0625, %v227_v55  ;;  %v702_v62 = vld [vmem:[%s994_s1 + $0xd0] ss:$8 sps:$4 sm:$0xff]  }
  0x28   :  { %593 = vmatprep.subr.bf16.mxu0 %v691_v56  ;;  %v239_v56 = vadd.f32 %v238_v37, %v237_v9  ;;  %v251_v60 = vadd.f32 %v250_v42, %v249_v10  ;;  %v271_v4 = vmul.f32 0.0625, %v215_v51  ;;  %v283_v8 = vmax.f32 %v267_v2, 0.0 }
  0x29   :  { %v265_v1 = vmul.f32 0.0625, %v179_v48  ;;  %v285_v9 = vmax.f32 %v269_v3, 0.0  ;;  %v295_v28 = vmax.f32 %v279_v6, 0.0  ;;  %v89_v6 = vadd.f32 %v63_v36, %v61_v34 }
  0x2a   :  { %v275_v11 = vmul.f32 0.0625, %v239_v56  ;;  %v277_v12 = vmul.f32 0.0625, %v251_v60  ;;  %v287_v10 = vmax.f32 %v271_v4, 0.0  ;;  %v299_v37 = vpack.c.bf16 %v283_v8, %v283_v8  ;;  %v703_v4 = vld [vmem:[%s994_s1 + $0xe4] ss:$8 sps:$4 sm:$0xff]  }
  0x2b   :  { %594 = vmatpush1.bf16.msra.mxu0 %v693_v7  ;;  %v281_v7 = vmax.f32 %v265_v1, 0.0  ;;  %v301_v42 = vpack.c.bf16 %v285_v9, %v285_v9  ;;  %v311_v51 = vpack.c.bf16 %v295_v28, %v295_v28  ;;  %v216_v34 = vrot.slane %v93_v15, 4 }
  0x2c   :  { %595 = vmatprep.subr.bf16.mxu0 %v694_v16  ;;  %v289_v16 = vmax.f32 %v273_v5, 0.0  ;;  %v291_v21 = vmax.f32 %v275_v11, 0.0  ;;  %v293_v23 = vmax.f32 %v277_v12, 0.0  ;;  %v303_v44 = vpack.c.bf16 %v287_v10, %v287_v10 }
  0x2d   :  { %v297_v35 = vpack.c.bf16 %v281_v7, %v281_v7  ;;  %v375_v55 = vunpack.c.l.b16 %v299_v37  ;;  %v377_v56 = vunpack.c.l.b16 %v301_v42  ;;  %v387_v3 = vunpack.c.l.b16 %v311_v51 }
  0x2e   :  { %v305_v48 = vpack.c.bf16 %v289_v16, %v289_v16  ;;  %v307_v58 = vpack.c.bf16 %v291_v21, %v291_v21  ;;  %v309_v50 = vpack.c.bf16 %v293_v23, %v293_v23  ;;  %v379_v60 = vunpack.c.l.b16 %v303_v44 }
  0x2f   :  { %596 = vmatpush1.bf16.msra.mxu0 %v696_v53  ;;  %v373_v53 = vunpack.c.l.b16 %v297_v35  ;;  %v85_v11 = vadd.f32 %v55_v22, %v53_v20  ;;  %v87_v12 = vadd.f32 %v59_v29, %v57_v27  ;;  %v99_v20 = vadd.f32 %v83_v63, %v81_v61 }
  0x30   :  { %597 = vmatprep.subr.bf16.mxu0 %v697_v0  ;;  %v381_v0 = vunpack.c.l.b16 %v305_v48  ;;  %v383_v1 = vunpack.c.l.b16 %v307_v58  ;;  %v385_v2 = vunpack.c.l.b16 %v309_v50  ;;  %v192_v27 = vrot.slane %v89_v6, 4 }
  0x31   :  { %v402_v5 = vsel %vm388_vm0, %v375_v55, %v373_v53  ;;  %v168_v22 = vrot.slane %v85_v11, 4  ;;  %v180_v26 = vrot.slane %v87_v12, 4  ;;  %v204_v29 = vrot.slane %v91_v14, 4 }
  0x32   :  { %v403_v7 = vsel %vm390_vm1, %v377_v56, %v402_v5  ;;  %v228_v36 = vrot.slane %v95_v17, 4  ;;  %v193_v40 = vadd.f32 %v192_v27, %v89_v6  ;;  %v217_v46 = vadd.f32 %v216_v34, %v93_v15 }
  0x33   :  { %598 = vmatpush1.bf16.msra.mxu0 %v699_v13  ;;  %v404_v18 = vsel %vm392_vm2, %v379_v60, %v403_v7  ;;  %v169_v33 = vadd.f32 %v168_v22, %v85_v11  ;;  %v181_v39 = vadd.f32 %v180_v26, %v87_v12  ;;  %v205_v41 = vadd.f32 %v204_v29, %v91_v14 }
  0x34   :  { %599 = vmatprep.subr.bf16.mxu0 %v700_v30  ;;  %v405_v25 = vsel %vm394_vm3, %v381_v0, %v404_v18  ;;  %v229_v47 = vadd.f32 %v228_v36, %v95_v17  ;;  %v194_v57 = vrot.slane %v193_v40, 2  ;;  %v218_v63 = vrot.slane %v217_v46, 2 }
  0x35   :  { %v406_v32 = vsel %vm396_vm4, %v383_v1, %v405_v25  ;;  %v170_v45 = vrot.slane %v169_v33, 2  ;;  %v182_v54 = vrot.slane %v181_v39, 2  ;;  %v206_v59 = vrot.slane %v205_v41, 2 }
  0x36   :  { %v407_v38 = vsel %vm398_vm5, %v385_v2, %v406_v32  ;;  %v230_v8 = vrot.slane %v229_v47, 2  ;;  %v240_v9 = vrot.slane %v97_v19, 4  ;;  %v195_v13 = vadd.f32 %v194_v57, %v193_v40 }
  0x37   :  { %600 = vmatpush1.bf16.msra.mxu0 %v702_v62  ;;  %v408_v43 = vsel %vm400_vm6, %v387_v3, %v407_v38  ;;  %v171_v61 = vadd.f32 %v170_v45, %v169_v33  ;;  %v183_v10 = vadd.f32 %v182_v54, %v181_v39  ;;  %v207_v16 = vadd.f32 %v206_v59, %v205_v41 }
  0x38   :  { %601 = vmatprep.subr.bf16.mxu0 %v703_v4  ;;  %v410_v52 = vpack.c.b16 %v408_v43, %v408_v43  ;;  %v252_v21 = vrot.slane %v99_v20, 4  ;;  %v219_v28 = vadd.f32 %v218_v63, %v217_v46  ;;  %v231_v30 = vadd.f32 %v230_v8, %v229_v47 }
  0x39   :  { %v172_v23 = vrot.slane %v171_v61, 1  ;;  %v241_v35 = vadd.f32 %v240_v9, %v97_v19  ;;  %v184_v37 = vrot.slane %v183_v10, 1  ;;  %v196_v42 = vrot.slane %v195_v13, 1 }
  0x3a   :  { %605 = vmatprep.mubr.bf16.mxu0 %v410_v52  ;;  %v208_v44 = vrot.slane %v207_v16, 1  ;;  %v253_v48 = vadd.f32 %v252_v21, %v99_v20  ;;  %v220_v50 = vrot.slane %v219_v28, 1  ;;  %v232_v51 = vrot.slane %v231_v30, 1 }
  0x3b   :  { %602 = vmatpush1.bf16.msra.mxu0 %v705_v24  ;;  %v173_v58 = vadd.f32 %v172_v23, %v171_v61  ;;  %v242_v53 = vrot.slane %v241_v35, 2  ;;  %v185_v55 = vadd.f32 %v184_v37, %v183_v10  ;;  %v197_v56 = vadd.f32 %v196_v42, %v195_v13 }
  0x3c   :  { %603 = vmatprep.subr.bf16.mxu0 %v706_v31  ;;  %v209_v60 = vadd.f32 %v208_v44, %v207_v16  ;;  %v254_v62 = vrot.slane %v253_v48, 2  ;;  %v221_v0 = vadd.f32 %v220_v50, %v219_v28  ;;  %v233_v1 = vadd.f32 %v232_v51, %v231_v30 }
  0x3d   :  { %v243_v2 = vadd.f32 %v242_v53, %v241_v35  ;;  %v264_v3 = vmul.f32 0.0625, %v173_v58  ;;  %v266_v5 = vmul.f32 0.0625, %v185_v55  ;;  %v268_v11 = vmul.f32 0.0625, %v197_v56  ;;  %v344_v35 = vld [vmem:[%s996_s2] sm:$0x3] }
  0x3e   :  { %v255_v4 = vadd.f32 %v254_v62, %v253_v48  ;;  %v270_v12 = vmul.f32 0.0625, %v209_v60  ;;  %v272_v7 = vmul.f32 0.0625, %v221_v0  ;;  %v274_v14 = vmul.f32 0.0625, %v233_v1 }
  0x3f   :  { %604 = vmatpush1.bf16.msra.mxu0 %v708_v49  ;;  %v244_v6 = vrot.slane %v243_v2, 1  ;;  %v280_v15 = vmax.f32 %v264_v3, 0.0  ;;  %v282_v18 = vmax.f32 %v266_v5, 0.0  ;;  %v284_v19 = vmax.f32 %v268_v11, 0.0 }
  0x40   :  { %v256_v17 = vrot.slane %v255_v4, 1  ;;  %v286_v20 = vmax.f32 %v270_v12, 0.0  ;;  %v288_v24 = vmax.f32 %v272_v7, 0.0  ;;  %v290_v25 = vmax.f32 %v274_v14, 0.0 }
  0x41   :  { %v245_v22 = vadd.f32 %v244_v6, %v243_v2  ;;  %v296_v26 = vpack.c.bf16 %v280_v15, %v280_v15  ;;  %v298_v29 = vpack.c.bf16 %v282_v18, %v282_v18  ;;  %v300_v31 = vpack.c.bf16 %v284_v19, %v284_v19 }
  0x42   :  { %v257_v27 = vadd.f32 %v256_v17, %v255_v4  ;;  %v302_v32 = vpack.c.bf16 %v286_v20, %v286_v20  ;;  %v304_v34 = vpack.c.bf16 %v288_v24, %v288_v24  ;;  %v306_v36 = vpack.c.bf16 %v290_v25, %v290_v25 }
  0x43   :  { %v276_v33 = vmul.f32 0.0625, %v245_v22  ;;  %v372_v38 = vunpack.c.l.b16 %v296_v26  ;;  %v374_v40 = vunpack.c.l.b16 %v298_v29  ;;  %v376_v41 = vunpack.c.l.b16 %v300_v31 }
  0x44   :  { %v278_v39 = vmul.f32 0.0625, %v257_v27  ;;  %v378_v43 = vunpack.c.l.b16 %v302_v32  ;;  %v380_v46 = vunpack.c.l.b16 %v304_v34  ;;  %v382_v49 = vunpack.c.l.b16 %v306_v36 }
  0x45   :  { %v292_v45 = vmax.f32 %v276_v33, 0.0  ;;  %v389_v52 = vsel %vm388_vm0, %v374_v40, %v372_v38  ;;  %v346_v23 = vlaneseq }
  0x46   :  { %v294_v47 = vmax.f32 %v278_v39, 0.0  ;;  %v391_v57 = vsel %vm390_vm1, %v376_v41, %v389_v52 }
  0x47   :  { %v308_v54 = vpack.c.bf16 %v292_v45, %v292_v45  ;;  %v393_v61 = vsel %vm392_vm2, %v378_v43, %v391_v57  ;;  %v347_v28 = vshrl.u32 %v346_v23, 7 }
  0x48   :  { %v310_v59 = vpack.c.bf16 %v294_v47, %v294_v47  ;;  %v395_v8 = vsel %vm394_vm3, %v380_v46, %v393_v61 }
  0x49   :  { %v384_v63 = vunpack.c.l.b16 %v308_v54  ;;  %v397_v10 = vsel %vm396_vm4, %v382_v49, %v395_v8  ;;  %v348_v30 = vsub.s32 0, %v347_v28  ;;  %v352_v37 = vsub.s32 1, %v347_v28 }
  0x4a   :  { %v386_v9 = vunpack.c.l.b16 %v310_v59 }
  0x4b   :  { %v399_v13 = vsel %vm398_vm5, %v384_v63, %v397_v10  ;;  %v349_v42 = vrot.slane %v344_v35, %v348_v30  ;;  %v353_v44 = vrot.slane %v344_v35, %v352_v37 }
  0x4c   :  { %v401_v16 = vsel %vm400_vm6, %v386_v9, %v399_v13 }
  0x4d   :  { %v409_v21 = vpack.c.b16 %v401_v16, %v401_v16 }
  0x4f   :  { %606 = vmatmul.mubr.bf16.vlgmr.msra.gmra.mrb[0].mxu0 %v409_v21 }
 0x122   :  { %v607_v48 = vpop.f32.mrb[0].mxu0 }
 0x123   :  { %v608_v58 = vadd.f32 %v607_v48, %v349_v42  ;;  %v609_v50 = vpop.f32.mrb[1].mxu0 }
 0x124   :  { %v610_v51 = vadd.f32 %v609_v50, %v353_v44  ;;  %v611_v53 = vpop.f32.mrb[2].mxu0 }
 0x125   :  { %v612_v55 = vpop.f32.mrb[3].mxu0  ;;  %v614_v56 = vmul.f32 %v608_v58, %v608_v58 }
 0x126   :  { %v615_v60 = vmul.f32 %v610_v51, %v610_v51 }
 0x128   :  { %v616_v62 = vadd.f32 %v615_v60, %v614_v56 }
 0x12a   :  { %617 = vadd.xlane.f32.xlu0 %v616_v62 }
 0x1b7   :  { %v618_v0 = vpop.xlane.xlu0 %617 }
 0x1b8   :  { %v619_v1 = vmax.f32 %v618_v0, 1e-24 }
 0x1ba   :  { %709 = vrsqrt.f32 %v619_v1 }
 0x1c4   :  { %v710_v2 = vpop.eup %709 }
 0x1c5   :  { %v621_v3 = vmul.f32 %v710_v2, %v608_v58  ;;  %v622_v4 = vmul.f32 %v710_v2, %v610_v51 }
 0x1c7   :  { %623 = vst [vmem:[%s997_s3] sm:$0xff] %v621_v3  ;;  %624 = vst [vmem:[%s997_s3 + $0x8] sm:$0xff] %v622_v4 }

</bundles_post_ra>
